<compile_context>
chip_gen: v6e
topology: v6e:2x2x1
jax: 0.10.0
libtpu: 0.0.40
codegen_flags: <defaults>
</compile_context>

<pallas_src>
import functools

import numpy as np

import jax
import jax.numpy as jnp
from jax.experimental import pallas as pl
from jax.experimental.pallas import tpu as pltpu


# ----------------------------------------------------------------------------
# Kernel helpers
# ----------------------------------------------------------------------------
def _conv3x3_rows(x_bf16, t_ref, is_top, is_bot, wc):
    """3x3 conv (stride 1, pad 1) on a (M, W*Cin) lane-dense slab.

    x_bf16 : (M, W*Cin) bf16 value, M = N*H, lane index = w*Cin + ci
    t_ref  : (W*Cin, 3*W*Cout) bf16 Toeplitz weights [T_kh0 | T_kh1 | T_kh2];
             kw taps and the W-direction zero padding are folded in.
    is_top / is_bot : (M, 1) bool masks for the H-direction zero padding.
    Returns (M, W*Cout) f32.
    """
    z = jnp.dot(x_bf16, t_ref[...], preferred_element_type=jnp.float32)
    z0 = z[:, :wc]            # 128-aligned lane slices -> free
    z1 = z[:, wc:2 * wc]
    z2 = z[:, 2 * wc:]

    m = z.shape[0]
    # out[n, h] = z0[n, h-1] + z1[n, h] + z2[n, h+1], zero outside [0, H).
    up = pltpu.roll(z0, shift=1, axis=0)        # up[m] = z0[m-1]   (wraps)
    dn = pltpu.roll(z2, shift=m - 1, axis=0)    # dn[m] = z2[m+1]   (wraps)
    up = jnp.where(is_top, 0.0, up)
    dn = jnp.where(is_bot, 0.0, dn)
    return z1 + up + dn


def _batchnorm_lane(acc, gamma_lane, beta_lane, w_dim, c_dim, inv_count, eps):
    """Training-mode BN over (N, H, W) in the (M, W*C) lane layout.

    Per-channel totals are obtained with a log2(W) strided roll-add tree over
    the lane axis (stride = C); the result is already broadcast back to lane
    layout, so no pooling matrix / tiny reshapes are needed.
    """
    lane_sum = jnp.sum(acc, axis=0, keepdims=True)            # (1, W*C)
    lane_sumsq = jnp.sum(acc * acc, axis=0, keepdims=True)    # (1, W*C)
    stats = jnp.concatenate([lane_sum, lane_sumsq], axis=0)   # (2, W*C)

    wc = w_dim * c_dim
    s = c_dim
    while s < wc:                                  # log2(W) XLU rolls
        stats = stats + pltpu.roll(stats, shift=s, axis=1)
        s *= 2

    mean = stats[0:1] * inv_count                  # (1, W*C) per-channel mean
    ex2 = stats[1:2] * inv_count
    var = ex2 - mean * mean                        # biased variance
    scale = gamma_lane * jax.lax.rsqrt(var + eps)  # EUP rsqrt
    shift = beta_lane - mean * scale
    return acc * scale + shift                     # fused affine


def basic_block_kernel(x_ref, t1_ref, g1_ref, b1_ref, t2_ref, g2_ref, b2_ref,
                       out_ref, *, h_dim, w_dim, c_dim, inv_count, eps):
    x = x_ref[...]                                 # (M, W*C) f32
    m = x.shape[0]
    wc = w_dim * c_dim

    # Hoisted H-padding masks (shared by both convs), (M, 1) iota only.
    row = jax.lax.broadcasted_iota(jnp.int32, (m, 1), 0)
    if (h_dim & (h_dim - 1)) == 0:
        h_idx = row & (h_dim - 1)
    else:
        h_idx = row % h_dim
    is_top = h_idx == 0
    is_bot = h_idx == (h_dim - 1)

    # conv1 -> bn1 -> relu   (bf16 MXU operands, f32 accumulate / elementwise)
    a1 = _conv3x3_rows(x.astype(jnp.bfloat16), t1_ref, is_top, is_bot, wc)
    h1 = jnp.maximum(
        _batchnorm_lane(a1, g1_ref[...], b1_ref[...],
                        w_dim, c_dim, inv_count, eps),
        0.0)

    # conv2 -> bn2
    a2 = _conv3x3_rows(h1.astype(jnp.bfloat16), t2_ref, is_top, is_bot, wc)
    h2 = _batchnorm_lane(a2, g2_ref[...], b2_ref[...],
                         w_dim, c_dim, inv_count, eps)

    # residual add (downsample is None => residual = x) + final relu
    out_ref[...] = jnp.maximum(h2 + x, 0.0)


# ----------------------------------------------------------------------------
# Host-side plumbing (layout only -- no FLOP hoisting)
# ----------------------------------------------------------------------------
def _toeplitz_cat_from_hwio(w_hwio, width):
    """(3,3,Cin,Cout) HWIO -> (W*Cin, 3*W*Cout) bf16 conv-as-matmul weights.

    Column blocks are [T_kh0 | T_kh1 | T_kh2]; kw taps and the W zero padding
    are folded into each block.
    """
    _, _, cin, cout = w_hwio.shape
    wi = np.arange(width)[:, None]
    wo = np.arange(width)[None, :]
    kw = wi - wo + 1                                    # tap index for (wi, wo)
    valid = ((kw >= 0) & (kw < 3)).astype(np.float32)   # W zero padding
    kw_c = np.clip(kw, 0, 2)
    # t[kh, wi, wo, ci, co] = w[kh, kw(wi,wo), ci, co]  (exact gather)
    t = w_hwio[:, kw_c, :, :] * jnp.asarray(valid)[None, :, :, None, None]
    t = jnp.transpose(t, (0, 1, 3, 2, 4))               # (3, wi, ci, wo, co)
    t = t.reshape(3, width * cin, width * cout)
    t_cat = jnp.concatenate([t[0], t[1], t[2]], axis=-1)   # (W*Cin, 3*W*Cout)
    return t_cat.astype(jnp.bfloat16)


def _lane_tile(v, width):
    """(C,) per-channel vector -> (1, W*C) lane layout (lane = w*C + c)."""
    return jnp.tile(v.astype(jnp.float32), width).reshape(1, -1)


def _full_spec(shape):
    n = len(shape)
    return pl.BlockSpec(shape, lambda i, _n=n: (0,) * _n)


def basic_block_forward(x_nchw, params, eps=1e-5):
    """x_nchw: (N, C, H, W) float32, PyTorch layout. Returns (N, C, H, W)."""
    w1, g1, b1, w2, g2, b2 = params
    N, C, H, W = x_nchw.shape
    cout = w1.shape[-1]
    assert C == cout, "downsample=None requires in_channels == out_channels"
    # TODO(synk): the lane roll-reduce tree assumes W is a power of two.
    assert (W & (W - 1)) == 0, "W must be a power of two for the roll tree"
    WC = W * C

    # NCHW -> lane-dense slab (N*H, W*C); kept f32 for the residual add.
    x_slab = (jnp.transpose(x_nchw, (0, 2, 3, 1))
              .reshape(N * H, WC).astype(jnp.float32))

    t1 = _toeplitz_cat_from_hwio(w1.astype(jnp.float32), W)   # (WC, 3*WC) bf16
    t2 = _toeplitz_cat_from_hwio(w2.astype(jnp.float32), W)
    g1l, b1l = _lane_tile(g1, W), _lane_tile(b1, W)            # (1, WC) f32
    g2l, b2l = _lane_tile(g2, W), _lane_tile(b2, W)

    grid_spec = pltpu.PrefetchScalarGridSpec(
        num_scalar_prefetch=0,
        grid=(1,),
        in_specs=[
            _full_spec(x_slab.shape),
            _full_spec(t1.shape),
            _full_spec(g1l.shape),
            _full_spec(b1l.shape),
            _full_spec(t2.shape),
            _full_spec(g2l.shape),
            _full_spec(b2l.shape),
        ],
        out_specs=_full_spec((N * H, WC)),
    )

    out_slab = pl.pallas_call(
        functools.partial(basic_block_kernel, h_dim=H, w_dim=W, c_dim=C,
                          inv_count=1.0 / float(N * H * W), eps=eps),
        out_shape=jax.ShapeDtypeStruct((N * H, WC), jnp.float32),
        grid_spec=grid_spec,
        compiler_params=pltpu.CompilerParams(
            dimension_semantics=("arbitrary",)),
    )(x_slab, t1, g1l, b1l, t2, g2l, b2l)

    out = out_slab.reshape(N, H, W, C)
    return jnp.transpose(out, (0, 3, 1, 2))                    # -> NCHW


# ----------------------------------------------------------------------------
# Pure-JAX reference (training-mode BN, f32, same semantics as the module)
# ----------------------------------------------------------------------------
def reference_forward(x_nchw, params, eps=1e-5):
    w1, g1, b1, w2, g2, b2 = params
    x = jnp.transpose(x_nchw, (0, 2, 3, 1)).astype(jnp.float32)   # NHWC

    def conv(y, w):
        return jax.lax.conv_general_dilated(
            y, w, window_strides=(1, 1), padding=((1, 1), (1, 1)),
            dimension_numbers=("NHWC", "HWIO", "NHWC"),
            precision=jax.lax.Precision.HIGHEST)

    def bn(y, g, b):
        mean = jnp.mean(y, axis=(0, 1, 2))
        var = jnp.mean((y - mean) ** 2, axis=(0, 1, 2))
        return (y - mean) * jax.lax.rsqrt(var + eps) * g + b

    h = jnp.maximum(bn(conv(x, w1), g1, b1), 0.0)
    h = bn(conv(h, w2), g2, b2)
    out = jnp.maximum(h + x, 0.0)
    return jnp.transpose(out, (0, 3, 1, 2))


def init_params(key, cin, cout):
    """Deterministic parameter init (shapes from BasicBlock.__init__)."""
    k1, k2, k3, k4, k5, k6 = jax.random.split(key, 6)
    w1 = 0.1 * jax.random.normal(k1, (3, 3, cin, cout), jnp.float32)   # HWIO
    w2 = 0.1 * jax.random.normal(k2, (3, 3, cout, cout), jnp.float32)
    g1 = 1.0 + 0.05 * jax.random.normal(k3, (cout,), jnp.float32)
    b1 = 0.05 * jax.random.normal(k4, (cout,), jnp.float32)
    g2 = 1.0 + 0.05 * jax.random.normal(k5, (cout,), jnp.float32)
    b2 = 0.05 * jax.random.normal(k6, (cout,), jnp.float32)
    return (w1, g1, b1, w2, g2, b2)


if __name__ == "__main__":
    key = jax.random.PRNGKey(0)
    kx, kp = jax.random.split(key)

    # in_channels == out_channels == 8; W*C = 128 -> fully lane-dense slabs.
    N, C, H, W = 2, 8, 16, 16
    x = jax.random.normal(kx, (N, C, H, W), jnp.float32)   # NCHW like PyTorch
    params = init_params(kp, C, C)

    out = jax.block_until_ready(basic_block_forward(x, params))
    ref = jax.block_until_ready(reference_forward(x, params))

    assert out.shape == (N, C, H, W)
    assert bool(jnp.all(jnp.isfinite(out)))
    assert bool(jnp.all(out >= 0.0))                       # final ReLU
    max_err = float(jnp.max(jnp.abs(out - ref)))
    # Tolerance widened for bf16 MXU operands (f32 accumulate), per review.
    assert max_err < 5e-2, f"mismatch vs pure-JAX reference: {max_err}"
    print("KERNEL_OK")
</pallas_src>

<mosaic_0001>
module attributes {stable_mosaic.version = 11 : i64} {
  func.func @basic_block_kernel(%arg0: i32, %arg1: memref<32x128xf32, #tpu.memory_space<vmem>>, %arg2: memref<128x384xbf16, #tpu.memory_space<vmem>>, %arg3: memref<1x128xf32, #tpu.memory_space<vmem>>, %arg4: memref<1x128xf32, #tpu.memory_space<vmem>>, %arg5: memref<128x384xbf16, #tpu.memory_space<vmem>>, %arg6: memref<1x128xf32, #tpu.memory_space<vmem>>, %arg7: memref<1x128xf32, #tpu.memory_space<vmem>>, %arg8: memref<32x128xf32, #tpu.memory_space<vmem>>) attributes {dimension_semantics = [#tpu.dimension_semantics<arbitrary>], iteration_bounds = array<i64: 1>, scalar_prefetch = 0 : i64, scratch_operands = 0 : i64, tpu.core_type = #tpu.core_type<tc>, window_params = [{pipeline_mode = #tpu.pipeline_mode<synchronous>, transform_indices = @transform_0, window_bounds = array<i64: 32, 128>}, {pipeline_mode = #tpu.pipeline_mode<synchronous>, transform_indices = @transform_1, window_bounds = array<i64: 128, 384>}, {pipeline_mode = #tpu.pipeline_mode<synchronous>, transform_indices = @transform_2, window_bounds = array<i64: 1, 128>}, {pipeline_mode = #tpu.pipeline_mode<synchronous>, transform_indices = @transform_3, window_bounds = array<i64: 1, 128>}, {pipeline_mode = #tpu.pipeline_mode<synchronous>, transform_indices = @transform_4, window_bounds = array<i64: 128, 384>}, {pipeline_mode = #tpu.pipeline_mode<synchronous>, transform_indices = @transform_5, window_bounds = array<i64: 1, 128>}, {pipeline_mode = #tpu.pipeline_mode<synchronous>, transform_indices = @transform_6, window_bounds = array<i64: 1, 128>}, {pipeline_mode = #tpu.pipeline_mode<synchronous>, transform_indices = @transform_7, window_bounds = array<i64: 32, 128>}]} {
    %c0 = arith.constant 0 : index
    %c0_0 = arith.constant 0 : index
    %0 = vector.load %arg1[%c0, %c0_0] : memref<32x128xf32, #tpu.memory_space<vmem>>, vector<32x128xf32>
    %1 = tpu.iota {dimensions = array<i32: 0>} : vector<32x1xi32>
    %c15_i32 = arith.constant 15 : i32
    %2 = vector.broadcast %c15_i32 : i32 to vector<32x1xi32>
    %3 = arith.andi %1, %2 : vector<32x1xi32>
    %c0_i32 = arith.constant 0 : i32
    %4 = vector.broadcast %c0_i32 : i32 to vector<32x1xi32>
    %5 = arith.cmpi eq, %3, %4 : vector<32x1xi32>
    %c15_i32_1 = arith.constant 15 : i32
    %6 = vector.broadcast %c15_i32_1 : i32 to vector<32x1xi32>
    %7 = arith.cmpi eq, %3, %6 : vector<32x1xi32>
    %8 = arith.truncf %0 : vector<32x128xf32> to vector<32x128xbf16>
    %c0_2 = arith.constant 0 : index
    %c0_3 = arith.constant 0 : index
    %9 = vector.load %arg2[%c0_2, %c0_3] : memref<128x384xbf16, #tpu.memory_space<vmem>>, vector<128x384xbf16>
    %cst = arith.constant dense<0.000000e+00> : vector<32x384xf32>
    %10 = tpu.matmul %8, %9, %cst {dimension_numbers = #tpu.dot_dimension_numbers<[1], [0], [0], [1], [0, 0, 1, 1], [], []>} : vector<32x128xbf16>, vector<128x384xbf16>, vector<32x384xf32> -> vector<32x384xf32>
    %11 = vector.extract_strided_slice %10 {offsets = [0, 0], sizes = [32, 128], strides = [1, 1]} : vector<32x384xf32> to vector<32x128xf32>
    %12 = vector.extract_strided_slice %10 {offsets = [0, 128], sizes = [32, 128], strides = [1, 1]} : vector<32x384xf32> to vector<32x128xf32>
    %13 = vector.extract_strided_slice %10 {offsets = [0, 256], sizes = [32, 128], strides = [1, 1]} : vector<32x384xf32> to vector<32x128xf32>
    %c1_i32 = arith.constant 1 : i32
    %14 = tpu.dynamic_rotate %11 by %c1_i32 dim 0 : vector<32x128xf32>, i32 -> vector<32x128xf32>
    %c31_i32 = arith.constant 31 : i32
    %15 = tpu.dynamic_rotate %13 by %c31_i32 dim 0 : vector<32x128xf32>, i32 -> vector<32x128xf32>
    %cst_4 = arith.constant 0.000000e+00 : f32
    %16 = vector.shape_cast %5 : vector<32x1xi1> to vector<32x1xi1>
    %17 = vector.broadcast %16 : vector<32x1xi1> to vector<32x128xi1>
    %18 = vector.broadcast %cst_4 : f32 to vector<32x128xf32>
    %19 = arith.select %17, %18, %14 : vector<32x128xi1>, vector<32x128xf32>
    %cst_5 = arith.constant 0.000000e+00 : f32
    %20 = vector.shape_cast %7 : vector<32x1xi1> to vector<32x1xi1>
    %21 = vector.broadcast %20 : vector<32x1xi1> to vector<32x128xi1>
    %22 = vector.broadcast %cst_5 : f32 to vector<32x128xf32>
    %23 = arith.select %21, %22, %15 : vector<32x128xi1>, vector<32x128xf32>
    %24 = arith.addf %12, %19 : vector<32x128xf32>
    %25 = arith.addf %24, %23 : vector<32x128xf32>
    %c0_6 = arith.constant 0 : index
    %c0_7 = arith.constant 0 : index
    %26 = vector.load %arg3[%c0_6, %c0_7] : memref<1x128xf32, #tpu.memory_space<vmem>>, vector<1x128xf32>
    %c0_8 = arith.constant 0 : index
    %c0_9 = arith.constant 0 : index
    %27 = vector.load %arg4[%c0_8, %c0_9] : memref<1x128xf32, #tpu.memory_space<vmem>>, vector<1x128xf32>
    %cst_10 = arith.constant dense<0.000000e+00> : vector<128xf32>
    %28 = vector.multi_reduction <add>, %25, %cst_10 [0] : vector<32x128xf32> to vector<128xf32>
    %29 = vector.shape_cast %28 : vector<128xf32> to vector<1x128xf32>
    %30 = arith.mulf %25, %25 : vector<32x128xf32>
    %cst_11 = arith.constant dense<0.000000e+00> : vector<128xf32>
    %31 = vector.multi_reduction <add>, %30, %cst_11 [0] : vector<32x128xf32> to vector<128xf32>
    %32 = vector.shape_cast %31 : vector<128xf32> to vector<1x128xf32>
    %33 = tpu.concatenate %29, %32 in 0 : vector<1x128xf32>, vector<1x128xf32> -> vector<2x128xf32>
    %c8_i32 = arith.constant 8 : i32
    %34 = tpu.dynamic_rotate %33 by %c8_i32 dim 1 : vector<2x128xf32>, i32 -> vector<2x128xf32>
    %35 = arith.addf %33, %34 : vector<2x128xf32>
    %c16_i32 = arith.constant 16 : i32
    %36 = tpu.dynamic_rotate %35 by %c16_i32 dim 1 : vector<2x128xf32>, i32 -> vector<2x128xf32>
    %37 = arith.addf %35, %36 : vector<2x128xf32>
    %c32_i32 = arith.constant 32 : i32
    %38 = tpu.dynamic_rotate %37 by %c32_i32 dim 1 : vector<2x128xf32>, i32 -> vector<2x128xf32>
    %39 = arith.addf %37, %38 : vector<2x128xf32>
    %c64_i32 = arith.constant 64 : i32
    %40 = tpu.dynamic_rotate %39 by %c64_i32 dim 1 : vector<2x128xf32>, i32 -> vector<2x128xf32>
    %41 = arith.addf %39, %40 : vector<2x128xf32>
    %42 = vector.extract_strided_slice %41 {offsets = [0, 0], sizes = [1, 128], strides = [1, 1]} : vector<2x128xf32> to vector<1x128xf32>
    %cst_12 = arith.constant 0.001953125 : f32
    %43 = vector.broadcast %cst_12 : f32 to vector<1x128xf32>
    %44 = arith.mulf %42, %43 : vector<1x128xf32>
    %45 = vector.extract_strided_slice %41 {offsets = [1, 0], sizes = [1, 128], strides = [1, 1]} : vector<2x128xf32> to vector<1x128xf32>
    %cst_13 = arith.constant 0.001953125 : f32
    %46 = vector.broadcast %cst_13 : f32 to vector<1x128xf32>
    %47 = arith.mulf %45, %46 : vector<1x128xf32>
    %48 = arith.mulf %44, %44 : vector<1x128xf32>
    %49 = arith.subf %47, %48 : vector<1x128xf32>
    %cst_14 = arith.constant 9.99999974E-6 : f32
    %50 = vector.broadcast %cst_14 : f32 to vector<1x128xf32>
    %51 = arith.addf %49, %50 : vector<1x128xf32>
    %52 = math.rsqrt %51 : vector<1x128xf32>
    %53 = arith.mulf %26, %52 : vector<1x128xf32>
    %54 = arith.mulf %44, %53 : vector<1x128xf32>
    %55 = arith.subf %27, %54 : vector<1x128xf32>
    %56 = vector.broadcast %53 : vector<1x128xf32> to vector<32x128xf32>
    %57 = arith.mulf %25, %56 : vector<32x128xf32>
    %58 = vector.broadcast %55 : vector<1x128xf32> to vector<32x128xf32>
    %59 = arith.addf %57, %58 : vector<32x128xf32>
    %cst_15 = arith.constant 0.000000e+00 : f32
    %60 = vector.broadcast %cst_15 : f32 to vector<32x128xf32>
    %61 = arith.maximumf %59, %60 : vector<32x128xf32>
    %62 = arith.truncf %61 : vector<32x128xf32> to vector<32x128xbf16>
    %c0_16 = arith.constant 0 : index
    %c0_17 = arith.constant 0 : index
    %63 = vector.load %arg5[%c0_16, %c0_17] : memref<128x384xbf16, #tpu.memory_space<vmem>>, vector<128x384xbf16>
    %cst_18 = arith.constant dense<0.000000e+00> : vector<32x384xf32>
    %64 = tpu.matmul %62, %63, %cst_18 {dimension_numbers = #tpu.dot_dimension_numbers<[1], [0], [0], [1], [0, 0, 1, 1], [], []>} : vector<32x128xbf16>, vector<128x384xbf16>, vector<32x384xf32> -> vector<32x384xf32>
    %65 = vector.extract_strided_slice %64 {offsets = [0, 0], sizes = [32, 128], strides = [1, 1]} : vector<32x384xf32> to vector<32x128xf32>
    %66 = vector.extract_strided_slice %64 {offsets = [0, 128], sizes = [32, 128], strides = [1, 1]} : vector<32x384xf32> to vector<32x128xf32>
    %67 = vector.extract_strided_slice %64 {offsets = [0, 256], sizes = [32, 128], strides = [1, 1]} : vector<32x384xf32> to vector<32x128xf32>
    %c1_i32_19 = arith.constant 1 : i32
    %68 = tpu.dynamic_rotate %65 by %c1_i32_19 dim 0 : vector<32x128xf32>, i32 -> vector<32x128xf32>
    %c31_i32_20 = arith.constant 31 : i32
    %69 = tpu.dynamic_rotate %67 by %c31_i32_20 dim 0 : vector<32x128xf32>, i32 -> vector<32x128xf32>
    %cst_21 = arith.constant 0.000000e+00 : f32
    %70 = vector.shape_cast %5 : vector<32x1xi1> to vector<32x1xi1>
    %71 = vector.broadcast %70 : vector<32x1xi1> to vector<32x128xi1>
    %72 = vector.broadcast %cst_21 : f32 to vector<32x128xf32>
    %73 = arith.select %71, %72, %68 : vector<32x128xi1>, vector<32x128xf32>
    %cst_22 = arith.constant 0.000000e+00 : f32
    %74 = vector.shape_cast %7 : vector<32x1xi1> to vector<32x1xi1>
    %75 = vector.broadcast %74 : vector<32x1xi1> to vector<32x128xi1>
    %76 = vector.broadcast %cst_22 : f32 to vector<32x128xf32>
    %77 = arith.select %75, %76, %69 : vector<32x128xi1>, vector<32x128xf32>
    %78 = arith.addf %66, %73 : vector<32x128xf32>
    %79 = arith.addf %78, %77 : vector<32x128xf32>
    %c0_23 = arith.constant 0 : index
    %c0_24 = arith.constant 0 : index
    %80 = vector.load %arg6[%c0_23, %c0_24] : memref<1x128xf32, #tpu.memory_space<vmem>>, vector<1x128xf32>
    %c0_25 = arith.constant 0 : index
    %c0_26 = arith.constant 0 : index
    %81 = vector.load %arg7[%c0_25, %c0_26] : memref<1x128xf32, #tpu.memory_space<vmem>>, vector<1x128xf32>
    %cst_27 = arith.constant dense<0.000000e+00> : vector<128xf32>
    %82 = vector.multi_reduction <add>, %79, %cst_27 [0] : vector<32x128xf32> to vector<128xf32>
    %83 = vector.shape_cast %82 : vector<128xf32> to vector<1x128xf32>
    %84 = arith.mulf %79, %79 : vector<32x128xf32>
    %cst_28 = arith.constant dense<0.000000e+00> : vector<128xf32>
    %85 = vector.multi_reduction <add>, %84, %cst_28 [0] : vector<32x128xf32> to vector<128xf32>
    %86 = vector.shape_cast %85 : vector<128xf32> to vector<1x128xf32>
    %87 = tpu.concatenate %83, %86 in 0 : vector<1x128xf32>, vector<1x128xf32> -> vector<2x128xf32>
    %c8_i32_29 = arith.constant 8 : i32
    %88 = tpu.dynamic_rotate %87 by %c8_i32_29 dim 1 : vector<2x128xf32>, i32 -> vector<2x128xf32>
    %89 = arith.addf %87, %88 : vector<2x128xf32>
    %c16_i32_30 = arith.constant 16 : i32
    %90 = tpu.dynamic_rotate %89 by %c16_i32_30 dim 1 : vector<2x128xf32>, i32 -> vector<2x128xf32>
    %91 = arith.addf %89, %90 : vector<2x128xf32>
    %c32_i32_31 = arith.constant 32 : i32
    %92 = tpu.dynamic_rotate %91 by %c32_i32_31 dim 1 : vector<2x128xf32>, i32 -> vector<2x128xf32>
    %93 = arith.addf %91, %92 : vector<2x128xf32>
    %c64_i32_32 = arith.constant 64 : i32
    %94 = tpu.dynamic_rotate %93 by %c64_i32_32 dim 1 : vector<2x128xf32>, i32 -> vector<2x128xf32>
    %95 = arith.addf %93, %94 : vector<2x128xf32>
    %96 = vector.extract_strided_slice %95 {offsets = [0, 0], sizes = [1, 128], strides = [1, 1]} : vector<2x128xf32> to vector<1x128xf32>
    %cst_33 = arith.constant 0.001953125 : f32
    %97 = vector.broadcast %cst_33 : f32 to vector<1x128xf32>
    %98 = arith.mulf %96, %97 : vector<1x128xf32>
    %99 = vector.extract_strided_slice %95 {offsets = [1, 0], sizes = [1, 128], strides = [1, 1]} : vector<2x128xf32> to vector<1x128xf32>
    %cst_34 = arith.constant 0.001953125 : f32
    %100 = vector.broadcast %cst_34 : f32 to vector<1x128xf32>
    %101 = arith.mulf %99, %100 : vector<1x128xf32>
    %102 = arith.mulf %98, %98 : vector<1x128xf32>
    %103 = arith.subf %101, %102 : vector<1x128xf32>
    %cst_35 = arith.constant 9.99999974E-6 : f32
    %104 = vector.broadcast %cst_35 : f32 to vector<1x128xf32>
    %105 = arith.addf %103, %104 : vector<1x128xf32>
    %106 = math.rsqrt %105 : vector<1x128xf32>
    %107 = arith.mulf %80, %106 : vector<1x128xf32>
    %108 = arith.mulf %98, %107 : vector<1x128xf32>
    %109 = arith.subf %81, %108 : vector<1x128xf32>
    %110 = vector.broadcast %107 : vector<1x128xf32> to vector<32x128xf32>
    %111 = arith.mulf %79, %110 : vector<32x128xf32>
    %112 = vector.broadcast %109 : vector<1x128xf32> to vector<32x128xf32>
    %113 = arith.addf %111, %112 : vector<32x128xf32>
    %114 = arith.addf %113, %0 : vector<32x128xf32>
    %cst_36 = arith.constant 0.000000e+00 : f32
    %115 = vector.broadcast %cst_36 : f32 to vector<32x128xf32>
    %116 = arith.maximumf %114, %115 : vector<32x128xf32>
    %c0_37 = arith.constant 0 : index
    %c0_38 = arith.constant 0 : index
    %117 = vector.load %arg8[%c0_37, %c0_38] : memref<32x128xf32, #tpu.memory_space<vmem>>, vector<32x128xf32>
    tpu.vector_store %arg8[%c0_37, %c0_38], %116 {strides = array<i32>} : memref<32x128xf32, #tpu.memory_space<vmem>>, vector<32x128xf32>,
    return
  }
  func.func @transform_0(%arg0: i32) -> (i32, i32) {
    %c0_i32 = arith.constant 0 : i32
    %c0_i32_0 = arith.constant 0 : i32
    %c0_i32_1 = arith.constant 0 : i32
    return %c0_i32, %c0_i32_0 : i32, i32
  }
  func.func @transform_1(%arg0: i32) -> (i32, i32) {
    %c0_i32 = arith.constant 0 : i32
    %c0_i32_0 = arith.constant 0 : i32
    %c0_i32_1 = arith.constant 0 : i32
    return %c0_i32, %c0_i32_0 : i32, i32
  }
  func.func @transform_2(%arg0: i32) -> (i32, i32) {
    %c0_i32 = arith.constant 0 : i32
    %c0_i32_0 = arith.constant 0 : i32
    %c0_i32_1 = arith.constant 0 : i32
    return %c0_i32, %c0_i32_0 : i32, i32
  }
  func.func @transform_3(%arg0: i32) -> (i32, i32) {
    %c0_i32 = arith.constant 0 : i32
    %c0_i32_0 = arith.constant 0 : i32
    %c0_i32_1 = arith.constant 0 : i32
    return %c0_i32, %c0_i32_0 : i32, i32
  }
  func.func @transform_4(%arg0: i32) -> (i32, i32) {
    %c0_i32 = arith.constant 0 : i32
    %c0_i32_0 = arith.constant 0 : i32
    %c0_i32_1 = arith.constant 0 : i32
    return %c0_i32, %c0_i32_0 : i32, i32
  }
  func.func @transform_5(%arg0: i32) -> (i32, i32) {
    %c0_i32 = arith.constant 0 : i32
    %c0_i32_0 = arith.constant 0 : i32
    %c0_i32_1 = arith.constant 0 : i32
    return %c0_i32, %c0_i32_0 : i32, i32
  }
  func.func @transform_6(%arg0: i32) -> (i32, i32) {
    %c0_i32 = arith.constant 0 : i32
    %c0_i32_0 = arith.constant 0 : i32
    %c0_i32_1 = arith.constant 0 : i32
    return %c0_i32, %c0_i32_0 : i32, i32
  }
  func.func @transform_7(%arg0: i32) -> (i32, i32) {
    %c0_i32 = arith.constant 0 : i32
    %c0_i32_0 = arith.constant 0 : i32
    %c0_i32_1 = arith.constant 0 : i32
    return %c0_i32, %c0_i32_0 : i32, i32
  }
}

</mosaic_0001>

<bundles_post_ra>
// kernel: tpu_custom_call.1
= control target key start
LH: loop header
LB: loop body
LE: loop exit
PB: predicated region body
PF: predicated region fallthrough
CT: control target
= control target key end

     0   :  { %12 = vsyncpa [#allocation3], 0  ;;  %s1409_s0 = inlined_call_operand.hbm [shape: f32[32,128], index: 0, kind: input, shape index: {}]   ;;  %s1410_s1 = inlined_call_operand.hbm [shape: bf16[128,384], index: 1, kind: input, shape index: {}]   ;;  %s1411_s2 = inlined_call_operand.vmem [shape: f32[1,128], index: 2, kind: input, shape index: {}]   ;;  %s1412_s3 = inlined_call_operand.vmem [shape: f32[1,128], index: 3, kind: input, shape index: {}]   ;;  %s1413_s4 = inlined_call_operand.hbm [shape: bf16[128,384], index: 4, kind: input, shape index: {}]   ;;  %s1414_s5 = inlined_call_operand.vmem [shape: f32[1,128], index: 5, kind: input, shape index: {}]   ;;  %s1415_s6 = inlined_call_operand.vmem [shape: f32[1,128], index: 6, kind: input, shape index: {}]   ;;  %s1416_s7 = inlined_call_operand.hbm [shape: f32[32,128], index: 7, kind: output, shape index: {}]  }
   0x1   :  { %13 = vsyncpa [#allocation6], 0 }
   0x2   :  { %14 = vsyncpa [#allocation4], 0  ;;  %s1180_s24 = smov [#allocation5]  }
   0x3   :  { %s32_s25 = sshll.u32 %s1180_s24, 4  ;;  %s33_s25 = int_to_ptr.vmem [resolvable:$true] %s32_s25 }
   0x4   :  { %s1102_s26 = scalar_lea.vmem %s33_s25, 3072  ;;  %p1107_p1 = scmp.lt.s32.totalorder %s33_s25, %s33_s25 }
   0x5   :  { %p1103_p0 = scmp.ne.s32.totalorder %s33_s25, %s1102_s26  ;;  %p1108_p2 = scmp.lt.s32.totalorder %s1102_s26, %s1102_s26 }
   0x7   :  { %p1109_p3 = por %p1108_p2, %p1107_p1 }
   0x9   :  { %p1110_p4 = pnand %p1109_p3, %p1103_p0 }
   0xb   :  { %1113 = shalt.err (!%p1110_p4)
}
   0xc   :  { %s1181_s27 = smov 192   ;;  %s1182_s28 = smov 12  }
   0xd   :  { %38 = dma.hbm_to_vmem [thread:$0]  %s1410_s1, 3072, %s33_s25, [#allocation6], %s1181_s27, %s1181_s27, %s1182_s28  }
   0xe   :  { %s1183_s8 = smov [#allocation2]  }
   0xf   :  { %s20_s9 = sshll.u32 %s1183_s8, 4  ;;  %s21_s9 = int_to_ptr.vmem [resolvable:$true] %s20_s9 }
  0x10   :  { %s1122_s10 = scalar_lea.vmem %s21_s9, 512  ;;  %p1127_p6 = scmp.lt.s32.totalorder %s21_s9, %s21_s9 }
  0x11   :  { %p1123_p5 = scmp.ne.s32.totalorder %s21_s9, %s1122_s10  ;;  %p1128_p7 = scmp.lt.s32.totalorder %s1122_s10, %s1122_s10 }
  0x13   :  { %p1129_p8 = por %p1128_p7, %p1127_p6 }
  0x15   :  { %p1130_p9 = pnand %p1129_p8, %p1123_p5 }
  0x17   :  { %1133 = shalt.err (!%p1130_p9)
}
  0x18   :  { %s1184_s11 = smov 128   ;;  %s1185_s12 = smov 8  }
  0x19   :  { %26 = dma.hbm_to_vmem [thread:$0]  %s1409_s0, 512, %s21_s9, [#allocation3], %s1184_s11, %s1184_s11, %s1185_s12  }
  0x1a   :  { %s1186_s1 = smov [#allocation7]  }
  0x1b   :  { %s48_s15 = sshll.u32 %s1186_s1, 4  ;;  %s49_s15 = int_to_ptr.vmem [resolvable:$true] %s48_s15 }
  0x1c   :  { %s1142_s16 = scalar_lea.vmem %s49_s15, 3072  ;;  %p1147_p11 = scmp.lt.s32.totalorder %s49_s15, %s49_s15 }
  0x1d   :  { %p1143_p10 = scmp.ne.s32.totalorder %s49_s15, %s1142_s16  ;;  %p1148_p12 = scmp.lt.s32.totalorder %s1142_s16, %s1142_s16 }
  0x1f   :  { %p1149_p13 = por %p1148_p12, %p1147_p11 }
  0x21   :  { %p1150_p0 = pnand %p1149_p13, %p1143_p10 }
  0x23   :  { %1153 = shalt.err (!%p1150_p0)
}
  0x24   :  { %54 = dma.hbm_to_vmem [thread:$0]  %s1413_s4, 3072, %s49_s15, [#allocation6], %s1181_s27, %s1181_s27, %s1182_s28  }
  0x25   :  { %1174 = dma.done.wait [#allocation3], 512  }
  0x26   :  { %1175 = vsyncadd [#allocation3], 4294966784 }
  0x27   :  { %1176 = dma.done.wait [#allocation6], 6144  }
  0x28   :  { %1177 = vsyncadd [#allocation6], 4294961152  ;;  %v1187_v0 = vmov 0   ;;  %v1026_v1 = vld [vmem:[#allocation5 + $0xac] ss:$12 sps:$4 sm:$0xff]   ;;  %v1246_v19 = vld [vmem:[#allocation2] sm:$0xff]  ;;  %v73_v31 = vlaneseq }
  0x29   :  { %284 = vmatprep.mubr.bf16.mxu0 %v1187_v0  ;;  %v1028_v2 = vld [vmem:[#allocation5 + $0xb0] ss:$12 sps:$4 sm:$0xff]   ;;  %252 = vmatprep.subr.bf16.mxu0 %v1026_v1  ;;  %v1029_v3 = vld [vmem:[#allocation5 + $0xa8] ss:$12 sps:$4 sm:$0xff]   ;;  %v1032_v5 = vld [vmem:[#allocation5 + $0x98] ss:$12 sps:$4 sm:$0xff]  }
  0x2a   :  { %973 = vmatprep.subr.bf16.mxu1 %v1028_v2  ;;  %v1030_v4 = vld [vmem:[#allocation5 + $0x94] ss:$12 sps:$4 sm:$0xff]   ;;  %253 = vmatpush1.bf16.msra.mxu0 %v1029_v3  ;;  %v1033_v6 = vld [vmem:[#allocation5 + $0x90] ss:$12 sps:$4 sm:$0xff]   ;;  %v1037_v9 = vld [vmem:[#allocation5 + $0x78] ss:$12 sps:$4 sm:$0xff]  }
  0x2b   :  { %974 = vmatpush3.bf16.msra.mxu1 %v1028_v2  ;;  %254 = vmatprep.subr.bf16.mxu0 %v1030_v4  ;;  %v1034_v7 = vld [vmem:[#allocation5 + $0x7c] ss:$12 sps:$4 sm:$0xff]   ;;  %v1036_v8 = vld [vmem:[#allocation5 + $0x80] ss:$12 sps:$4 sm:$0xff]   ;;  %v1038_v10 = vld [vmem:[#allocation5 + $0x64] ss:$12 sps:$4 sm:$0xff]  }
  0x2c   :  { %975 = vmatprep.subr.bf16.mxu1 %v1032_v5  ;;  %v1040_v11 = vld [vmem:[#allocation5 + $0x68] ss:$12 sps:$4 sm:$0xff]   ;;  %v1041_v12 = vld [vmem:[#allocation5 + $0x60] ss:$12 sps:$4 sm:$0xff]   ;;  %v1044_v14 = vld [vmem:[#allocation5 + $0x50] ss:$12 sps:$4 sm:$0xff]  }
  0x2d   :  { %v1042_v13 = vld [vmem:[#allocation5 + $0x4c] ss:$12 sps:$4 sm:$0xff]   ;;  %v1045_v15 = vld [vmem:[#allocation5 + $0x48] ss:$12 sps:$4 sm:$0xff]   ;;  %v1049_v18 = vld [vmem:[#allocation5 + $0x30] ss:$12 sps:$4 sm:$0xff]  }
  0x2e   :  { %255 = vmatpush1.bf16.msra.mxu0 %v1033_v6  ;;  %v1046_v16 = vld [vmem:[#allocation5 + $0x34] ss:$12 sps:$4 sm:$0xff]   ;;  %v1048_v17 = vld [vmem:[#allocation5 + $0x38] ss:$12 sps:$4 sm:$0xff]   ;;  %v1050_v20 = vld [vmem:[#allocation5 + $0x1c] ss:$12 sps:$4 sm:$0xff]  }
  0x2f   :  { %976 = vmatpush3.bf16.msra.mxu1 %v1032_v5  ;;  %256 = vmatprep.subr.bf16.mxu0 %v1034_v7  ;;  %v1052_v21 = vld [vmem:[#allocation5 + $0x20] ss:$12 sps:$4 sm:$0xff]   ;;  %v1053_v24 = vld [vmem:[#allocation5 + $0x18] ss:$12 sps:$4 sm:$0xff]   ;;  %v1056_v26 = vld [vmem:[#allocation5 + $0x8] ss:$12 sps:$4 sm:$0xff]  }
  0x30   :  { %977 = vmatprep.subr.bf16.mxu1 %v1036_v8  ;;  %v1248_v22 = vld [vmem:[#allocation2 + $0x8] sm:$0xff]  ;;  %v1054_v25 = vld [vmem:[#allocation5 + $0x4] ss:$12 sps:$4 sm:$0xff]   ;;  %v1254_v29 = vld [vmem:[#allocation2 + $0x18] sm:$0xff]  ;;  %v1260_v32 = vshrl.u32 %v73_v31, 7  ;;  %vm428_vm6 = vcmask 1040384  }
  0x31   :  { %v90_v23 = vpack.c.bf16 %v1248_v22, %v1246_v19  ;;  %v1057_v27 = vld [vmem:[#allocation5] ss:$12 sps:$4 sm:$0xff]   ;;  %v1252_v28 = vld [vmem:[#allocation2 + $0x10] sm:$0xff]  ;;  %s1188_s0 = smov 16   ;;  %s1189_s4 = smov 32  }
  0x32   :  { %257 = vmatpush1.bf16.msra.mxu0 %v1037_v9  ;;  %v91_v30 = vpack.c.bf16 %v1254_v29, %v1252_v28  ;;  %v76_v35 = vadd.s32 16, %v1260_v32  ;;  %v75_v38 = vadd.s32 8, %v1260_v32  ;;  %vm358_vm0 = vcmp.lt.s32.totalorder %v1260_v32, 1  ;;  %s1190_s19 = smov 64  }
  0x33   :  { %978 = vmatpush3.bf16.msra.mxu1 %v1036_v8  ;;  %258 = vmatprep.subr.bf16.mxu0 %v1038_v10  ;;  %vm367_vm1 = vcmp.lt.s32.totalorder %v1260_v32, 7  ;;  %v78_v50 = vand.u32 15, %v1260_v32  ;;  %v77_v51 = vadd.s32 24, %v1260_v32 }
  0x34   :  { %979 = vmatprep.subr.bf16.mxu1 %v1040_v11  ;;  %989 = vmatprep.mubr.bf16.mxu1 %v90_v23  ;;  %v80_v41 = vand.u32 15, %v76_v35  ;;  %v79_v46 = vand.u32 15, %v75_v38 }
  0x35   :  { %vm1284_vm4 = vcmp.eq.s32.totalorder %v78_v50, 0  ;;  %v81_v62 = vand.u32 15, %v77_v51 }
  0x36   :  { %259 = vmatpush1.bf16.msra.mxu0 %v1041_v12  ;;  %vm1268_vm2 = vcmp.eq.s32.totalorder %v80_v41, 0  ;;  %vm1274_vm3 = vcmp.eq.s32.totalorder %v79_v46, 15 }
  0x37   :  { %980 = vmatpush3.bf16.msra.mxu1 %v1040_v11  ;;  %260 = vmatprep.subr.bf16.mxu0 %v1042_v13  ;;  %vm1296_vm5 = vcmp.eq.s32.totalorder %v81_v62, 15  ;;  %v1062_v62 = vld [vmem:[#allocation7 + $0x90] ss:$12 sps:$4 sm:$0xff]  }
  0x38   :  { %981 = vmatprep.subr.bf16.mxu1 %v1044_v14 }
  0x3a   :  { %261 = vmatpush1.bf16.msra.mxu0 %v1045_v15 }
  0x3b   :  { %982 = vmatpush3.bf16.msra.mxu1 %v1044_v14  ;;  %262 = vmatprep.subr.bf16.mxu0 %v1046_v16 }
  0x3c   :  { %983 = vmatprep.subr.bf16.mxu1 %v1048_v17 }
  0x3e   :  { %263 = vmatpush1.bf16.msra.mxu0 %v1049_v18 }
  0x3f   :  { %984 = vmatpush3.bf16.msra.mxu1 %v1048_v17  ;;  %264 = vmatprep.subr.bf16.mxu0 %v1050_v20 }
  0x40   :  { %985 = vmatprep.subr.bf16.mxu1 %v1052_v21 }
  0x42   :  { %265 = vmatpush1.bf16.msra.mxu0 %v1053_v24 }
  0x43   :  { %986 = vmatpush3.bf16.msra.mxu1 %v1052_v21  ;;  %266 = vmatprep.subr.bf16.mxu0 %v1054_v25 }
  0x44   :  { %987 = vmatprep.subr.bf16.mxu1 %v1056_v26 }
  0x46   :  { %267 = vmatpush1.bf16.msra.mxu0 %v1057_v27 }
  0x47   :  { %988 = vmatpush3.bf16.msra.mxu1 %v1056_v26 }
  0x49   :  { %285 = vmatmul.mubr.bf16.vlgmr.msra.gmra.mxu0 %v90_v23 }
  0x4a   :  { %990 = vmatmul.mubr.bf16.vlgmr.msra.gmra.mxu1 %v91_v30  ;;  %294 = vmatprep.mubr.bf16.mxu0 %v1187_v0 }
  0x51   :  { %295 = vmatmul.mubr.bf16.gmra.mxu0 %v91_v30 }
  0x52   :  { %688 = vmatprep.mubr.bf16.mxu0 %v1187_v0 }
 0x109   :  { %v286_v33 = vpop.f32.mrf.mxu0 }
 0x10a   :  { %v991_v34 = vpop.f32.mrf.mxu1  ;;  %v354_v48 = vrot.slane %v286_v33, 7 }
 0x10b   :  { %v288_v36 = vpop.f32.mrf.mxu0  ;;  %v365_v45 = vrot.slane %v991_v34, 1 }
 0x10c   :  { %v339_v37 = vpop.f32.mrf.mxu1 }
 0x10d   :  { %v290_v39 = vpop.f32.mrf.mxu0  ;;  %v363_v63 = vrot.slane %v339_v37, 1 }
 0x10e   :  { %v992_v40 = vpop.f32.mrf.mxu1  ;;  %v355_v42 = vrot.slane %v290_v39, 7 }
 0x10f   :  { %v292_v43 = vpop.f32.mrf.mxu0  ;;  %v366_v1 = vrot.slane %v992_v40, 1 }
 0x110   :  { %v342_v44 = vpop.f32.mrf.mxu1  ;;  %v361_v54 = vsel %vm358_vm0, %v354_v48, %v355_v42 }
 0x111   :  { %v364_v47 = vrot.slane %v342_v44, 1  ;;  %v296_v49 = vpop.f32.mrf.mxu0  ;;  %v397_v2 = vadd.f32 %v361_v54, %v292_v43  ;;  %v371_v13 = vsel %vm367_vm1, %v366_v1, %v363_v63  ;;  %v368_v16 = vsel %vm367_vm1, %v365_v45, %v366_v1  ;;  %v1068_v1 = vld [vmem:[#allocation7 + $0x7c] ss:$12 sps:$4 sm:$0xff]  }
 0x112   :  { %v356_v52 = vrot.slane %v296_v49, 7  ;;  %v395_v20 = vsel %vm1296_vm5, 0.0, %v371_v13  ;;  %v1078_v13 = vld [vmem:[#allocation7 + $0x30] ss:$12 sps:$4 sm:$0xff]  }
 0x113   :  { %v298_v55 = vpop.f32.mrf.mxu0  ;;  %v369_v57 = vsel %vm367_vm1, %v364_v47, %v365_v45  ;;  %v370_v15 = vsel %vm367_vm1, %v363_v63, %v364_v47  ;;  %v1065_v63 = vld [vmem:[#allocation7 + $0x98] ss:$12 sps:$4 sm:$0xff]  }
 0x114   :  { %v360_v58 = vsel %vm358_vm0, %v355_v42, %v356_v52  ;;  %v393_v4 = vsel %vm1274_vm3, 0.0, %v369_v57  ;;  %v1060_v57 = vld [vmem:[#allocation7 + $0xac] ss:$12 sps:$4 sm:$0xff]  }
 0x115   :  { %v382_v59 = vsel %vm1268_vm2, 0.0, %v360_v58  ;;  %v300_v61 = vpop.f32.mrf.mxu0  ;;  %v1300_v11 = vadd.f32 %v397_v2, %v393_v4  ;;  %v1058_v58 = vld [vmem:[#allocation7 + $0xa8] ss:$12 sps:$4 sm:$0xff]   ;;  %656 = vmatprep.subr.bf16.mxu0 %v1060_v57  ;;  %v1066_v2 = vld [vmem:[#allocation7 + $0x78] ss:$12 sps:$4 sm:$0xff]  }
 0x116   :  { %v357_v3 = vrot.slane %v300_v61, 7  ;;  %v398_v6 = vadd.f32 %v382_v59, %v298_v55  ;;  %v1061_v59 = vld [vmem:[#allocation7 + $0xb0] ss:$12 sps:$4 sm:$0xff]   ;;  %657 = vmatpush1.bf16.msra.mxu0 %v1058_v58  ;;  %v1064_v61 = vld [vmem:[#allocation7 + $0x94] ss:$12 sps:$4 sm:$0xff]  }
 0x117   :  { %v302_v5 = vpop.f32.mrf.mxu0  ;;  %v416_v21 = vmul.f32 %v1300_v11, %v1300_v11  ;;  %993 = vmatprep.subr.bf16.mxu1 %v1061_v59  ;;  %658 = vmatprep.subr.bf16.mxu0 %v1064_v61  ;;  %v1072_v4 = vld [vmem:[#allocation7 + $0x64] ss:$12 sps:$4 sm:$0xff]  }
 0x118   :  { %v362_v7 = vsel %vm358_vm0, %v357_v3, %v354_v48  ;;  %v359_v8 = vsel %vm358_vm0, %v356_v52, %v357_v3  ;;  %v1308_v17 = vadd.f32 %v398_v6, %v368_v16  ;;  %994 = vmatpush3.bf16.msra.mxu1 %v1061_v59  ;;  %v1069_v3 = vld [vmem:[#allocation7 + $0x80] ss:$12 sps:$4 sm:$0xff]   ;;  %v1073_v6 = vld [vmem:[#allocation7 + $0x68] ss:$12 sps:$4 sm:$0xff]   ;;  %v1082_v16 = vld [vmem:[#allocation7 + $0x18] ss:$12 sps:$4 sm:$0xff]  }
 0x119   :  { %v380_v9 = vsel %vm1284_vm4, 0.0, %v362_v7  ;;  %v399_v14 = vadd.f32 %v359_v8, %v302_v5  ;;  %995 = vmatprep.subr.bf16.mxu1 %v1065_v63  ;;  %v1070_v5 = vld [vmem:[#allocation7 + $0x60] ss:$12 sps:$4 sm:$0xff]   ;;  %v1074_v8 = vld [vmem:[#allocation7 + $0x48] ss:$12 sps:$4 sm:$0xff]  }
 0x11a   :  { %v396_v12 = vadd.f32 %v380_v9, %v288_v36  ;;  %v417_v26 = vmul.f32 %v1308_v17, %v1308_v17  ;;  %659 = vmatpush1.bf16.msra.mxu0 %v1062_v62  ;;  %v1076_v7 = vld [vmem:[#allocation7 + $0x4c] ss:$12 sps:$4 sm:$0xff]   ;;  %v1077_v9 = vld [vmem:[#allocation7 + $0x50] ss:$12 sps:$4 sm:$0xff]  }
 0x11b   :  { %v1318_v24 = vadd.f32 %v399_v14, %v395_v20  ;;  %660 = vmatprep.subr.bf16.mxu0 %v1068_v1  ;;  %v1081_v14 = vld [vmem:[#allocation7 + $0x38] ss:$12 sps:$4 sm:$0xff]   ;;  %v1085_v20 = vld [vmem:[#allocation7 + $0x20] ss:$12 sps:$4 sm:$0xff]  }
 0x11c   :  { %v1310_v18 = vadd.f32 %v396_v12, %v370_v15  ;;  %996 = vmatpush3.bf16.msra.mxu1 %v1065_v63  ;;  %v1080_v12 = vld [vmem:[#allocation7 + $0x34] ss:$12 sps:$4 sm:$0xff]   ;;  %v1084_v15 = vld [vmem:[#allocation7 + $0x1c] ss:$12 sps:$4 sm:$0xff]  }
 0x11d   :  { %v418_v33 = vmul.f32 %v1318_v24, %v1318_v24  ;;  %997 = vmatprep.subr.bf16.mxu1 %v1069_v3 }
 0x11e   :  { %v415_v23 = vmul.f32 %v1310_v18, %v1310_v18  ;;  %v406_v25 = vadd.f32 %v1300_v11, %v1310_v18  ;;  %661 = vmatpush1.bf16.msra.mxu0 %v1066_v2 }
 0x11f   :  { %662 = vmatprep.subr.bf16.mxu0 %v1072_v4 }
 0x120   :  { %v407_v27 = vadd.f32 %v406_v25, %v1308_v17  ;;  %v419_v30 = vadd.f32 %v416_v21, %v415_v23  ;;  %998 = vmatpush3.bf16.msra.mxu1 %v1069_v3  ;;  %v1088_v21 = vld [vmem:[#allocation7 + $0x4] ss:$12 sps:$4 sm:$0xff]   ;;  %v1089_v23 = vld [vmem:[#allocation7 + $0x8] ss:$12 sps:$4 sm:$0xff]   ;;  %v1086_v25 = vld [vmem:[#allocation7] ss:$12 sps:$4 sm:$0xff]  }
 0x121   :  { %999 = vmatprep.subr.bf16.mxu1 %v1073_v6 }
 0x122   :  { %v408_v31 = vadd.f32 %v407_v27, %v1318_v24  ;;  %v420_v34 = vadd.f32 %v419_v30, %v417_v26  ;;  %663 = vmatpush1.bf16.msra.mxu0 %v1070_v5 }
 0x123   :  { %664 = vmatprep.subr.bf16.mxu0 %v1076_v7 }
 0x124   :  { %v409_v35 = vrot.slane %v408_v31, 4  ;;  %v421_v36 = vadd.f32 %v420_v34, %v418_v33  ;;  %1000 = vmatpush3.bf16.msra.mxu1 %v1073_v6 }
 0x125   :  { %1001 = vmatprep.subr.bf16.mxu1 %v1077_v9 }
 0x126   :  { %v410_v37 = vadd.f32 %v409_v35, %v408_v31  ;;  %v422_v38 = vrot.slane %v421_v36, 4  ;;  %665 = vmatpush1.bf16.msra.mxu0 %v1074_v8 }
 0x127   :  { %666 = vmatprep.subr.bf16.mxu0 %v1080_v12 }
 0x128   :  { %v411_v39 = vrot.slane %v410_v37, 2  ;;  %v423_v40 = vadd.f32 %v422_v38, %v421_v36  ;;  %1002 = vmatpush3.bf16.msra.mxu1 %v1077_v9  ;;  %v1191_v36 = vmov 1966171168  }
 0x129   :  { %1003 = vmatprep.subr.bf16.mxu1 %v1081_v14 }
 0x12a   :  { %v412_v41 = vadd.f32 %v411_v39, %v410_v37  ;;  %v424_v42 = vrot.slane %v423_v40, 2  ;;  %667 = vmatpush1.bf16.msra.mxu0 %v1078_v13  ;;  %v452_v37 = vunpack.c.l.s4 %v1191_v36 }
 0x12b   :  { %668 = vmatprep.subr.bf16.mxu0 %v1084_v15 }
 0x12c   :  { %v413_v43 = vrot.slane %v412_v41, 1  ;;  %v425_v44 = vadd.f32 %v424_v42, %v423_v40  ;;  %1004 = vmatpush3.bf16.msra.mxu1 %v1081_v14  ;;  %v453_v38 = vunpack.c.0.s8 %v452_v37 }
 0x12d   :  { %1005 = vmatprep.subr.bf16.mxu1 %v1085_v20 }
 0x12e   :  { %v426_v45 = vrot.slane %v425_v44, 1  ;;  %v414_v46 = vadd.f32 %v413_v43, %v412_v41  ;;  %669 = vmatpush1.bf16.msra.mxu0 %v1082_v16  ;;  %v1334_v39 = vsub.s32 %v453_v38, %v1260_v32  ;;  %v404_v43 = vld [vmem:[%s1411_s2] sm:$0x1] }
 0x12f   :  { %670 = vmatprep.subr.bf16.mxu0 %v1088_v21 }
 0x130   :  { %v427_v47 = vadd.f32 %v426_v45, %v425_v44  ;;  %1006 = vmatpush3.bf16.msra.mxu1 %v1085_v20  ;;  %v1341_v44 = vsub.s32 0, %v1260_v32 }
 0x131   :  { %1007 = vmatprep.subr.bf16.mxu1 %v1089_v23 }
 0x132   :  { %v429_v48 = vsel %vm428_vm6, %v414_v46, %v427_v47  ;;  %671 = vmatpush1.bf16.msra.mxu0 %v1086_v25  ;;  %v405_v47 = vld [vmem:[%s1412_s3] sm:$0x1] }
 0x133   :  { %430 = vrot.lane.b32.xlu0 %v429_v48, %s1185_s12 }
 0x134   :  { %1008 = vmatpush3.bf16.msra.mxu1 %v1089_v23 }
 0x1a5   :  { %v431_v49 = vpop.permute.xlu0 %430 }
 0x1a6   :  { %v432_v50 = vadd.f32 %v431_v49, %v429_v48 }
 0x1a8   :  { %433 = vrot.lane.b32.xlu0 %v432_v50, %s1188_s0 }
 0x21a   :  { %v434_v51 = vpop.permute.xlu0 %433 }
 0x21b   :  { %v435_v52 = vadd.f32 %v434_v51, %v432_v50 }
 0x21d   :  { %436 = vrot.lane.b32.xlu1 %v435_v52, %s1189_s4 }
 0x28f   :  { %v437_v54 = vpop.permute.xlu1 %436 }
 0x290   :  { %v438_v55 = vadd.f32 %v437_v54, %v435_v52 }
 0x292   :  { %439 = vrot.lane.b32.xlu1 %v438_v55, %s1190_s19 }
 0x304   :  { %v440_v26 = vpop.permute.xlu1 %439 }
 0x305   :  { %v441_v27 = vadd.f32 %v440_v26, %v438_v55 }
 0x307   :  { %v442_v30 = vmul.f32 0.001953125, %v441_v27 }
 0x309   :  { %v443_v31 = vmul.f32 %v442_v30, %v442_v30 }
 0x30b   :  { %v445_v33 = vrot.slane %v443_v31, 7 }
 0x30d   :  { %v447_v34 = vsub.f32 %v442_v30, %v445_v33 }
 0x30f   :  { %v448_v35 = vadd.f32 1e-05, %v447_v34 }
 0x311   :  { %1090 = vrsqrt.f32 %v448_v35 }
 0x31e   :  { %v1091_v40 = vpop.eup %1090 }
 0x31f   :  { %v457_v41 = vrot.slane %v1091_v40, %v1334_v39 }
 0x321   :  { %v458_v42 = vcombine.high %v457_v41, %v457_v41 }
 0x323   :  { %v465_v45 = vrot.slane %v458_v42, %v1334_v39 }
 0x325   :  { %v467_v46 = vmul.f32 %v465_v45, %v404_v43 }
 0x327   :  { %v468_v48 = vmul.f32 %v467_v46, %v442_v30  ;;  %v474_v49 = vrot.slane %v467_v46, %v1341_v44 }
 0x329   :  { %v469_v50 = vsub.f32 %v405_v47, %v468_v48  ;;  %v476_v51 = vmul.f32 %v474_v49, %v1310_v18  ;;  %v477_v54 = vmul.f32 %v474_v49, %v1300_v11  ;;  %v478_v55 = vmul.f32 %v474_v49, %v1308_v17 }
 0x32a   :  { %v479_v57 = vmul.f32 %v474_v49, %v1318_v24 }
 0x32b   :  { %v484_v52 = vrot.slane %v469_v50, %v1341_v44 }
 0x32d   :  { %v486_v58 = vadd.f32 %v484_v52, %v476_v51  ;;  %v487_v59 = vadd.f32 %v484_v52, %v477_v54  ;;  %v488_v61 = vadd.f32 %v484_v52, %v478_v55  ;;  %v489_v62 = vadd.f32 %v484_v52, %v479_v57 }
 0x32f   :  { %v490_v63 = vmax.f32 %v486_v58, 0.0  ;;  %v491_v1 = vmax.f32 %v487_v59, 0.0  ;;  %v492_v2 = vmax.f32 %v488_v61, 0.0  ;;  %v493_v3 = vmax.f32 %v489_v62, 0.0 }
 0x331   :  { %v494_v4 = vpack.c.bf16 %v491_v1, %v490_v63  ;;  %v495_v5 = vpack.c.bf16 %v493_v3, %v492_v2 }
 0x333   :  { %689 = vmatmul.mubr.bf16.vlgmr.msra.gmra.mxu0 %v494_v4  ;;  %1009 = vmatprep.mubr.bf16.mxu1 %v494_v4 }
 0x334   :  { %1010 = vmatmul.mubr.bf16.vlgmr.msra.gmra.mxu1 %v495_v5  ;;  %698 = vmatprep.mubr.bf16.mxu0 %v1187_v0 }
 0x33b   :  { %699 = vmatmul.mubr.bf16.gmra.mxu0 %v495_v5 }
 0x3f3   :  { %v690_v11 = vpop.f32.mrf.mxu0 }
 0x3f4   :  { %v1011_v17 = vpop.f32.mrf.mxu1  ;;  %v758_v20 = vrot.slane %v690_v11, 7 }
 0x3f5   :  { %v692_v18 = vpop.f32.mrf.mxu0  ;;  %v768_v15 = vrot.slane %v1011_v17, 1 }
 0x3f6   :  { %v743_v24 = vpop.f32.mrf.mxu1 }
 0x3f7   :  { %v694_v6 = vpop.f32.mrf.mxu0  ;;  %v766_v33 = vrot.slane %v743_v24, 1 }
 0x3f8   :  { %v1012_v7 = vpop.f32.mrf.mxu1  ;;  %v759_v12 = vrot.slane %v694_v6, 7 }
 0x3f9   :  { %v696_v8 = vpop.f32.mrf.mxu0  ;;  %v769_v30 = vrot.slane %v1012_v7, 1 }
 0x3fa   :  { %v746_v9 = vpop.f32.mrf.mxu1  ;;  %v764_v25 = vsel %vm358_vm0, %v758_v20, %v759_v12 }
 0x3fb   :  { %v767_v13 = vrot.slane %v746_v9, 1  ;;  %v700_v14 = vpop.f32.mrf.mxu0  ;;  %v783_v36 = vadd.f32 %v764_v25, %v696_v8  ;;  %v773_v43 = vsel %vm367_vm1, %v769_v30, %v766_v33  ;;  %v770_v46 = vsel %vm367_vm1, %v768_v15, %v769_v30 }
 0x3fc   :  { %v760_v16 = vrot.slane %v700_v14, 7  ;;  %v781_v49 = vsel %vm1296_vm5, 0.0, %v773_v43 }
 0x3fd   :  { %v702_v21 = vpop.f32.mrf.mxu0  ;;  %v771_v23 = vsel %vm367_vm1, %v767_v13, %v768_v15  ;;  %v772_v45 = vsel %vm367_vm1, %v766_v33, %v767_v13 }
 0x3fe   :  { %v763_v0 = vsel %vm358_vm0, %v759_v12, %v760_v16  ;;  %v779_v34 = vsel %vm1274_vm3, 0.0, %v771_v23 }
 0x3ff   :  { %v776_v26 = vsel %vm1268_vm2, 0.0, %v763_v0  ;;  %v704_v27 = vpop.f32.mrf.mxu0  ;;  %v1370_v41 = vadd.f32 %v783_v36, %v779_v34 }
 0x400   :  { %v761_v31 = vrot.slane %v704_v27, 7  ;;  %v784_v37 = vadd.f32 %v776_v26, %v702_v21 }
 0x401   :  { %v706_v35 = vpop.f32.mrf.mxu0  ;;  %v802_v60 = vmul.f32 %v1370_v41, %v1370_v41 }
 0x402   :  { %v765_v38 = vsel %vm358_vm0, %v761_v31, %v758_v20  ;;  %v762_v40 = vsel %vm358_vm0, %v760_v16, %v761_v31  ;;  %v788_v47 = vadd.f32 %v784_v37, %v770_v46  ;;  %v790_v31 = vld [vmem:[%s1414_s5] sm:$0x1]  ;;  %s1192_s5 = smov [#allocation8]  }
 0x403   :  { %v774_v53 = vsel %vm1284_vm4, 0.0, %v765_v38  ;;  %v785_v56 = vadd.f32 %v762_v40, %v706_v35  ;;  %v791_v35 = vld [vmem:[%s1415_s6] sm:$0x1]  ;;  %s892_s26 = sshll.u32 %s1192_s5, 4  ;;  %s893_s26 = int_to_ptr.vmem [resolvable:$true] %s892_s26 }
 0x404   :  { %v782_v42 = vadd.f32 %v774_v53, %v692_v18  ;;  %v803_v54 = vmul.f32 %v788_v47, %v788_v47  ;;  %s1154_s6 = scalar_lea.vmem %s893_s26, 512  ;;  %p1159_p2 = scmp.lt.s32.totalorder %s893_s26, %s893_s26 }
 0x405   :  { %v789_v51 = vadd.f32 %v785_v56, %v781_v49  ;;  %p1155_p1 = scmp.ne.s32.totalorder %s893_s26, %s1154_s6  ;;  %p1160_p3 = scmp.lt.s32.totalorder %s1154_s6, %s1154_s6 }
 0x406   :  { %v786_v48 = vadd.f32 %v782_v42, %v772_v45 }
 0x407   :  { %v804_v59 = vmul.f32 %v789_v51, %v789_v51  ;;  %p1161_p4 = por %p1160_p3, %p1159_p2 }
 0x408   :  { %v801_v50 = vmul.f32 %v786_v48, %v786_v48  ;;  %v792_v52 = vadd.f32 %v1370_v41, %v786_v48 }
 0x409   :  { %p1162_p5 = pnand %p1161_p4, %p1155_p1 }
 0x40a   :  { %v793_v55 = vadd.f32 %v792_v52, %v788_v47  ;;  %v805_v57 = vadd.f32 %v802_v60, %v801_v50 }
 0x40c   :  { %v794_v58 = vadd.f32 %v793_v55, %v789_v51  ;;  %v806_v61 = vadd.f32 %v805_v57, %v803_v54 }
 0x40e   :  { %v795_v32 = vrot.slane %v794_v58, 4  ;;  %v807_v62 = vadd.f32 %v806_v61, %v804_v59 }
 0x410   :  { %v796_v63 = vadd.f32 %v795_v32, %v794_v58  ;;  %v808_v1 = vrot.slane %v807_v62, 4 }
 0x412   :  { %v797_v2 = vrot.slane %v796_v63, 2  ;;  %v809_v10 = vadd.f32 %v808_v1, %v807_v62 }
 0x414   :  { %v798_v3 = vadd.f32 %v797_v2, %v796_v63  ;;  %v810_v4 = vrot.slane %v809_v10, 2 }
 0x416   :  { %v799_v5 = vrot.slane %v798_v3, 1  ;;  %v811_v11 = vadd.f32 %v810_v4, %v809_v10 }
 0x418   :  { %v812_v17 = vrot.slane %v811_v11, 1  ;;  %v800_v18 = vadd.f32 %v799_v5, %v798_v3 }
 0x41a   :  { %v813_v24 = vadd.f32 %v812_v17, %v811_v11 }
 0x41c   :  { %v814_v6 = vsel %vm428_vm6, %v800_v18, %v813_v24 }
 0x41d   :  { %815 = vrot.lane.b32.xlu0 %v814_v6, %s1185_s12 }
 0x48f   :  { %v816_v7 = vpop.permute.xlu0 %815 }
 0x490   :  { %v817_v8 = vadd.f32 %v816_v7, %v814_v6 }
 0x492   :  { %818 = vrot.lane.b32.xlu1 %v817_v8, %s1188_s0 }
 0x504   :  { %v819_v9 = vpop.permute.xlu1 %818 }
 0x505   :  { %v820_v12 = vadd.f32 %v819_v9, %v817_v8 }
 0x507   :  { %821 = vrot.lane.b32.xlu0 %v820_v12, %s1189_s4 }
 0x579   :  { %v822_v13 = vpop.permute.xlu0 %821 }
 0x57a   :  { %v823_v14 = vadd.f32 %v822_v13, %v820_v12 }
 0x57c   :  { %824 = vrot.lane.b32.xlu1 %v823_v14, %s1190_s19 }
 0x5ee   :  { %v825_v15 = vpop.permute.xlu1 %824 }
 0x5ef   :  { %v826_v16 = vadd.f32 %v825_v15, %v823_v14 }
 0x5f1   :  { %v827_v20 = vmul.f32 0.001953125, %v826_v16 }
 0x5f3   :  { %v828_v21 = vmul.f32 %v827_v20, %v827_v20 }
 0x5f5   :  { %v830_v23 = vrot.slane %v828_v21, 7 }
 0x5f7   :  { %v832_v0 = vsub.f32 %v827_v20, %v830_v23 }
 0x5f9   :  { %v833_v25 = vadd.f32 1e-05, %v832_v0 }
 0x5fb   :  { %1092 = vrsqrt.f32 %v833_v25 }
 0x608   :  { %v1093_v26 = vpop.eup %1092 }
 0x609   :  { %v842_v27 = vrot.slane %v1093_v26, %v1334_v39 }
 0x60b   :  { %v843_v30 = vcombine.high %v842_v27, %v842_v27 }
 0x60d   :  { %v850_v33 = vrot.slane %v843_v30, %v1334_v39 }
 0x60f   :  { %v852_v34 = vmul.f32 %v850_v33, %v790_v31 }
 0x611   :  { %v853_v36 = vmul.f32 %v852_v34, %v827_v20  ;;  %v859_v37 = vrot.slane %v852_v34, %v1341_v44 }
 0x613   :  { %v854_v38 = vsub.f32 %v791_v35, %v853_v36  ;;  %v861_v40 = vmul.f32 %v859_v37, %v786_v48  ;;  %v862_v42 = vmul.f32 %v859_v37, %v1370_v41  ;;  %v863_v43 = vmul.f32 %v859_v37, %v788_v47 }
 0x614   :  { %v864_v56 = vmul.f32 %v859_v37, %v789_v51 }
 0x615   :  { %v869_v53 = vrot.slane %v854_v38, %v1341_v44 }
 0x617   :  { %v871_v45 = vadd.f32 %v869_v53, %v861_v40  ;;  %v872_v46 = vadd.f32 %v869_v53, %v862_v42  ;;  %v873_v49 = vadd.f32 %v869_v53, %v863_v43  ;;  %v874_v39 = vadd.f32 %v869_v53, %v864_v56 }
 0x619   :  { %v875_v60 = vadd.f32 %v871_v45, %v1246_v19  ;;  %v876_v50 = vadd.f32 %v872_v46, %v1248_v22  ;;  %v877_v52 = vadd.f32 %v873_v49, %v1252_v28  ;;  %v878_v48 = vadd.f32 %v874_v39, %v1254_v29 }
 0x61b   :  { %v879_v54 = vmax.f32 %v875_v60, 0.0  ;;  %v880_v44 = vmax.f32 %v876_v50, 0.0  ;;  %v881_v55 = vmax.f32 %v877_v52, 0.0  ;;  %v882_v41 = vmax.f32 %v878_v48, 0.0 }
 0x61d   :  { %883 = vst [vmem:[#allocation8] sm:$0xff] %v879_v54  ;;  %884 = vst [vmem:[#allocation8 + $0x8] sm:$0xff] %v880_v44 }
 0x61e   :  { %885 = vst [vmem:[#allocation8 + $0x10] sm:$0xff] %v881_v55  ;;  %886 = vst [vmem:[#allocation8 + $0x18] sm:$0xff] %v882_v41 }
 0x61f   :  { %1165 = shalt.err (!%p1162_p5)
}
 0x620   :  { %898 = dma.vmem_to_hbm [thread:$0]  %s893_s26, 512, %s1416_s7, [#allocation4], %s1184_s11, %s1184_s11, %s1185_s12  }
 0x621   :  { %1178 = dma.done.wait [#allocation4], 512  }
 0x622   :  { %1179 = vsyncadd [#allocation4], 4294966784 }
 0x623   :  { %902 = vsyncpa [#allocation3], 1 }
 0x624   :  { %903 = vsyncpa [#allocation6], 1 }
 0x625   :  { %904 = vsyncpa [#allocation4], 1 }

</bundles_post_ra>
